<compile_context>
chip_gen: v6e
topology: v6e:2x2x1
jax: 0.10.0
libtpu: 0.0.40
codegen_flags: <defaults>
</compile_context>

<pallas_src>
import functools

import numpy as np
import jax
import jax.numpy as jnp
from jax.experimental import pallas as pl
from jax.experimental.pallas import tpu as pltpu

EPS = 1e-5


def fused_conv_bn_relu_kernel(x_ref, w_ref, mask_ref, o_ref, *, N, H, W, Wp, eps):
    # x_ref   : (N, Cin, L)      flattened zero-padded NCHW planes, L=(H+3)*(W+2),
    #                            flat index = row*Wp + col (channel-major, no transpose).
    # w_ref   : (Cout, 9*Cin)    conv weight, columns ordered (ky, kx, cin).
    # mask_ref: (1, H*Wp) f32    1.0 on the W valid columns of each Wp-stride row.
    # o_ref   : (N, Cout, H*Wp)  conv->BN->ReLU result, NCHW layout with padded row
    #                            stride (wrapper drops the 2 junk columns per row).
    M = H * Wp
    inv_cnt = 1.0 / float(N * H * W)
    w2 = w_ref[...]                                  # (Cout, 9*Cin), matmul dtype
    mask = mask_ref[...]                             # (1, M) f32
    offsets = [ky * Wp + kx for ky in range(3) for kx in range(3)]

    # ---- conv (one MXU dot per image) + first-pass channel sums -----------------
    convs = []
    s = None
    for n in range(N):
        xi = x_ref[n]                                # (Cin, L), matmul dtype
        # Patch matrix: nine contiguous lane slices of the flat padded plane,
        # stacked on the sublane axis (no cross-lane reshapes).
        patches = jnp.concatenate([xi[:, off:off + M] for off in offsets], axis=0)
        conv = jnp.dot(w2, patches,
                       preferred_element_type=jnp.float32)          # (Cout, M) f32
        convs.append(conv)
        cs = jnp.sum(conv * mask, axis=1, keepdims=True)            # (Cout, 1)
        s = cs if s is None else s + cs
    mean = s * inv_cnt                                               # (Cout, 1)

    # ---- second pass: cancellation-safe variance --------------------------------
    v = None
    for n in range(N):
        d = (convs[n] - mean) * mask
        dv = jnp.sum(d * d, axis=1, keepdims=True)
        v = dv if v is None else v + dv
    var = v * inv_cnt
    rstd = jax.lax.rsqrt(var + eps)                                  # EUP slot

    # ---- normalize + ReLU + store ------------------------------------------------
    for n in range(N):
        o_ref[n] = jnp.maximum((convs[n] - mean) * rstd, 0.0).astype(o_ref.dtype)


@functools.partial(jax.jit, static_argnames=("matmul_dtype",))
def basic_layer_forward(x_nchw, w_oihw, *, matmul_dtype=jnp.float32):
    """Conv2d(3x3, s1, p1, no bias) -> BatchNorm2d(affine=False, batch stats) -> ReLU.

    x_nchw: (N, Cin, H, W) f32; w_oihw: (Cout, Cin, 3, 3) f32 -> (N, Cout, H, W) f32.
    matmul_dtype=jnp.bfloat16 casts only the MXU operands (recommended on v6e/v7x);
    accumulation and all elementwise/stat math stay f32.
    """
    N, Cin, H, W = x_nchw.shape
    Cout = w_oihw.shape[0]
    Wp = W + 2                  # padded row stride (left/right zero columns)
    Hp2 = H + 3                 # 1 top + 2 bottom zero rows (2nd bottom row only
                                # keeps the largest shifted tap slice in-bounds)
    L = Hp2 * Wp
    M = H * Wp                  # per-image output lanes (incl. 2 junk cols per row)

    # Glue in: zero-pad + flatten the padded plane; NO layout transpose (stays NCHW).
    xpad = jnp.pad(x_nchw, ((0, 0), (0, 0), (1, 2), (1, 1)))
    x3 = xpad.reshape(N, Cin, L).astype(matmul_dtype)
    w2 = jnp.transpose(w_oihw, (0, 2, 3, 1)).reshape(Cout, 9 * Cin).astype(matmul_dtype)

    # Valid-column mask (host constant): 1 on the W real columns of each Wp-stride row.
    mask_np = np.zeros((H, Wp), np.float32)
    mask_np[:, :W] = 1.0
    mask = jnp.asarray(mask_np.reshape(1, M))

    out_flat = pl.pallas_call(
        functools.partial(fused_conv_bn_relu_kernel, N=N, H=H, W=W, Wp=Wp, eps=EPS),
        out_shape=jax.ShapeDtypeStruct((N, Cout, M), jnp.float32),
        grid=(1,),
        in_specs=[
            pl.BlockSpec((N, Cin, L), lambda i: (0, 0, 0)),          # whole batch
            pl.BlockSpec((Cout, 9 * Cin), lambda i: (0, 0)),         # weight resident
            pl.BlockSpec((1, M), lambda i: (0, 0)),                  # valid-col mask
        ],
        out_specs=pl.BlockSpec((N, Cout, M), lambda i: (0, 0, 0)),
        compiler_params=pltpu.CompilerParams(
            dimension_semantics=("arbitrary",),   # single step: no megacore split
            vmem_limit_bytes=32 * 1024 * 1024,
        ),
    )(x3, w2, mask)

    # Glue out: drop the 2 junk columns of each Wp-stride row; already NCHW.
    return out_flat.reshape(N, Cout, H, Wp)[:, :, :, :W]


if __name__ == "__main__":
    key = jax.random.PRNGKey(0)
    kx_key, kw_key = jax.random.split(key)

    # Small shapes consistent with the module's forward.
    N, Cin, Cout, H, W = 2, 4, 8, 16, 16

    x = jax.random.normal(kx_key, (N, Cin, H, W), dtype=jnp.float32)

    # Deterministic Conv2d-default-style init (uniform with fan_in scaling), no bias.
    fan_in = Cin * 3 * 3
    bound = float(fan_in) ** -0.5
    w = jax.random.uniform(kw_key, (Cout, Cin, 3, 3), jnp.float32, -bound, bound)

    out = jax.block_until_ready(basic_layer_forward(x, w))

    # Pure-JAX reference (conv -> training-mode batch-stats BN -> ReLU).
    ref_conv = jax.lax.conv_general_dilated(
        x, w, window_strides=(1, 1), padding=((1, 1), (1, 1)),
        dimension_numbers=("NCHW", "OIHW", "NCHW"))
    mean = ref_conv.mean(axis=(0, 2, 3), keepdims=True)
    var = ref_conv.var(axis=(0, 2, 3), keepdims=True)
    ref = jnp.maximum((ref_conv - mean) * jax.lax.rsqrt(var + EPS), 0.0)

    assert out.shape == (N, Cout, H, W)
    err = float(jnp.abs(out - ref).max())
    assert jnp.allclose(out, ref, atol=1e-4, rtol=1e-4), err

    # bf16 MXU-operand path (v6e/v7x recommended); looser tolerance by design.
    out_bf16 = jax.block_until_ready(
        basic_layer_forward(x, w, matmul_dtype=jnp.bfloat16))
    err_bf16 = float(jnp.abs(out_bf16 - ref).max())
    assert jnp.allclose(out_bf16, ref, atol=7.5e-2, rtol=7.5e-2), err_bf16

    print("KERNEL_OK")
</pallas_src>

<mosaic_0001>
module attributes {stable_mosaic.version = 11 : i64} {
  func.func @fused_conv_bn_relu_kernel(%arg0: i32, %arg1: memref<2x4x342xf32, #tpu.memory_space<vmem>>, %arg2: memref<8x36xf32, #tpu.memory_space<vmem>>, %arg3: memref<1x288xf32, #tpu.memory_space<vmem>>, %arg4: memref<2x8x288xf32, #tpu.memory_space<vmem>>) attributes {dimension_semantics = [#tpu.dimension_semantics<arbitrary>], iteration_bounds = array<i64: 1>, scalar_prefetch = 0 : i64, scratch_operands = 0 : i64, tpu.core_type = #tpu.core_type<tc>, window_params = [{pipeline_mode = #tpu.pipeline_mode<synchronous>, transform_indices = @transform_0, window_bounds = array<i64: 2, 4, 342>}, {pipeline_mode = #tpu.pipeline_mode<synchronous>, transform_indices = @transform_1, window_bounds = array<i64: 8, 36>}, {pipeline_mode = #tpu.pipeline_mode<synchronous>, transform_indices = @transform_2, window_bounds = array<i64: 1, 288>}, {pipeline_mode = #tpu.pipeline_mode<synchronous>, transform_indices = @transform_3, window_bounds = array<i64: 2, 8, 288>}]} {
    %c0 = arith.constant 0 : index
    %c0_0 = arith.constant 0 : index
    %0 = vector.load %arg2[%c0, %c0_0] : memref<8x36xf32, #tpu.memory_space<vmem>>, vector<8x36xf32>
    %c0_1 = arith.constant 0 : index
    %c0_2 = arith.constant 0 : index
    %1 = vector.load %arg3[%c0_1, %c0_2] : memref<1x288xf32, #tpu.memory_space<vmem>>, vector<1x288xf32>
    %c0_3 = arith.constant 0 : index
    %c0_4 = arith.constant 0 : index
    %c0_5 = arith.constant 0 : index
    %2 = vector.load %arg1[%c0_3, %c0_4, %c0_5] : memref<2x4x342xf32, #tpu.memory_space<vmem>>, vector<1x4x342xf32>
    %3 = vector.shape_cast %2 : vector<1x4x342xf32> to vector<4x342xf32>
    %4 = vector.extract_strided_slice %3 {offsets = [0, 0], sizes = [4, 288], strides = [1, 1]} : vector<4x342xf32> to vector<4x288xf32>
    %5 = vector.extract_strided_slice %3 {offsets = [0, 1], sizes = [4, 288], strides = [1, 1]} : vector<4x342xf32> to vector<4x288xf32>
    %6 = vector.extract_strided_slice %3 {offsets = [0, 2], sizes = [4, 288], strides = [1, 1]} : vector<4x342xf32> to vector<4x288xf32>
    %7 = vector.extract_strided_slice %3 {offsets = [0, 18], sizes = [4, 288], strides = [1, 1]} : vector<4x342xf32> to vector<4x288xf32>
    %8 = vector.extract_strided_slice %3 {offsets = [0, 19], sizes = [4, 288], strides = [1, 1]} : vector<4x342xf32> to vector<4x288xf32>
    %9 = vector.extract_strided_slice %3 {offsets = [0, 20], sizes = [4, 288], strides = [1, 1]} : vector<4x342xf32> to vector<4x288xf32>
    %10 = vector.extract_strided_slice %3 {offsets = [0, 36], sizes = [4, 288], strides = [1, 1]} : vector<4x342xf32> to vector<4x288xf32>
    %11 = vector.extract_strided_slice %3 {offsets = [0, 37], sizes = [4, 288], strides = [1, 1]} : vector<4x342xf32> to vector<4x288xf32>
    %12 = vector.extract_strided_slice %3 {offsets = [0, 38], sizes = [4, 288], strides = [1, 1]} : vector<4x342xf32> to vector<4x288xf32>
    %13 = tpu.concatenate %4, %5, %6, %7, %8, %9, %10, %11, %12 in 0 : vector<4x288xf32>, vector<4x288xf32>, vector<4x288xf32>, vector<4x288xf32>, vector<4x288xf32>, vector<4x288xf32>, vector<4x288xf32>, vector<4x288xf32>, vector<4x288xf32> -> vector<36x288xf32>
    %cst = arith.constant dense<0.000000e+00> : vector<8x288xf32>
    %14 = tpu.matmul %0, %13, %cst {dimension_numbers = #tpu.dot_dimension_numbers<[1], [0], [0], [1], [0, 0, 1, 1], [], []>} : vector<8x36xf32>, vector<36x288xf32>, vector<8x288xf32> -> vector<8x288xf32>
    %15 = vector.broadcast %1 : vector<1x288xf32> to vector<8x288xf32>
    %16 = arith.mulf %14, %15 : vector<8x288xf32>
    %cst_6 = arith.constant dense<0.000000e+00> : vector<8xf32>
    %17 = vector.multi_reduction <add>, %16, %cst_6 [1] : vector<8x288xf32> to vector<8xf32>
    %18 = vector.shape_cast %17 : vector<8xf32> to vector<8x1xf32>
    %c1 = arith.constant 1 : index
    %c0_7 = arith.constant 0 : index
    %c0_8 = arith.constant 0 : index
    %19 = vector.load %arg1[%c1, %c0_7, %c0_8] : memref<2x4x342xf32, #tpu.memory_space<vmem>>, vector<1x4x342xf32>
    %20 = vector.shape_cast %19 : vector<1x4x342xf32> to vector<4x342xf32>
    %21 = vector.extract_strided_slice %20 {offsets = [0, 0], sizes = [4, 288], strides = [1, 1]} : vector<4x342xf32> to vector<4x288xf32>
    %22 = vector.extract_strided_slice %20 {offsets = [0, 1], sizes = [4, 288], strides = [1, 1]} : vector<4x342xf32> to vector<4x288xf32>
    %23 = vector.extract_strided_slice %20 {offsets = [0, 2], sizes = [4, 288], strides = [1, 1]} : vector<4x342xf32> to vector<4x288xf32>
    %24 = vector.extract_strided_slice %20 {offsets = [0, 18], sizes = [4, 288], strides = [1, 1]} : vector<4x342xf32> to vector<4x288xf32>
    %25 = vector.extract_strided_slice %20 {offsets = [0, 19], sizes = [4, 288], strides = [1, 1]} : vector<4x342xf32> to vector<4x288xf32>
    %26 = vector.extract_strided_slice %20 {offsets = [0, 20], sizes = [4, 288], strides = [1, 1]} : vector<4x342xf32> to vector<4x288xf32>
    %27 = vector.extract_strided_slice %20 {offsets = [0, 36], sizes = [4, 288], strides = [1, 1]} : vector<4x342xf32> to vector<4x288xf32>
    %28 = vector.extract_strided_slice %20 {offsets = [0, 37], sizes = [4, 288], strides = [1, 1]} : vector<4x342xf32> to vector<4x288xf32>
    %29 = vector.extract_strided_slice %20 {offsets = [0, 38], sizes = [4, 288], strides = [1, 1]} : vector<4x342xf32> to vector<4x288xf32>
    %30 = tpu.concatenate %21, %22, %23, %24, %25, %26, %27, %28, %29 in 0 : vector<4x288xf32>, vector<4x288xf32>, vector<4x288xf32>, vector<4x288xf32>, vector<4x288xf32>, vector<4x288xf32>, vector<4x288xf32>, vector<4x288xf32>, vector<4x288xf32> -> vector<36x288xf32>
    %cst_9 = arith.constant dense<0.000000e+00> : vector<8x288xf32>
    %31 = tpu.matmul %0, %30, %cst_9 {dimension_numbers = #tpu.dot_dimension_numbers<[1], [0], [0], [1], [0, 0, 1, 1], [], []>} : vector<8x36xf32>, vector<36x288xf32>, vector<8x288xf32> -> vector<8x288xf32>
    %32 = vector.broadcast %1 : vector<1x288xf32> to vector<8x288xf32>
    %33 = arith.mulf %31, %32 : vector<8x288xf32>
    %cst_10 = arith.constant dense<0.000000e+00> : vector<8xf32>
    %34 = vector.multi_reduction <add>, %33, %cst_10 [1] : vector<8x288xf32> to vector<8xf32>
    %35 = vector.shape_cast %34 : vector<8xf32> to vector<8x1xf32>
    %36 = arith.addf %18, %35 : vector<8x1xf32>
    %cst_11 = arith.constant 0.001953125 : f32
    %37 = vector.broadcast %cst_11 : f32 to vector<8x1xf32>
    %38 = arith.mulf %36, %37 : vector<8x1xf32>
    %39 = vector.broadcast %38 : vector<8x1xf32> to vector<8x288xf32>
    %40 = arith.subf %14, %39 : vector<8x288xf32>
    %41 = vector.broadcast %1 : vector<1x288xf32> to vector<8x288xf32>
    %42 = arith.mulf %40, %41 : vector<8x288xf32>
    %43 = arith.mulf %42, %42 : vector<8x288xf32>
    %cst_12 = arith.constant dense<0.000000e+00> : vector<8xf32>
    %44 = vector.multi_reduction <add>, %43, %cst_12 [1] : vector<8x288xf32> to vector<8xf32>
    %45 = vector.shape_cast %44 : vector<8xf32> to vector<8x1xf32>
    %46 = vector.broadcast %38 : vector<8x1xf32> to vector<8x288xf32>
    %47 = arith.subf %31, %46 : vector<8x288xf32>
    %48 = vector.broadcast %1 : vector<1x288xf32> to vector<8x288xf32>
    %49 = arith.mulf %47, %48 : vector<8x288xf32>
    %50 = arith.mulf %49, %49 : vector<8x288xf32>
    %cst_13 = arith.constant dense<0.000000e+00> : vector<8xf32>
    %51 = vector.multi_reduction <add>, %50, %cst_13 [1] : vector<8x288xf32> to vector<8xf32>
    %52 = vector.shape_cast %51 : vector<8xf32> to vector<8x1xf32>
    %53 = arith.addf %45, %52 : vector<8x1xf32>
    %cst_14 = arith.constant 0.001953125 : f32
    %54 = vector.broadcast %cst_14 : f32 to vector<8x1xf32>
    %55 = arith.mulf %53, %54 : vector<8x1xf32>
    %cst_15 = arith.constant 9.99999974E-6 : f32
    %56 = vector.broadcast %cst_15 : f32 to vector<8x1xf32>
    %57 = arith.addf %55, %56 : vector<8x1xf32>
    %58 = math.rsqrt %57 : vector<8x1xf32>
    %59 = vector.broadcast %38 : vector<8x1xf32> to vector<8x288xf32>
    %60 = arith.subf %14, %59 : vector<8x288xf32>
    %61 = vector.broadcast %58 : vector<8x1xf32> to vector<8x288xf32>
    %62 = arith.mulf %60, %61 : vector<8x288xf32>
    %cst_16 = arith.constant 0.000000e+00 : f32
    %63 = vector.broadcast %cst_16 : f32 to vector<8x288xf32>
    %64 = arith.maximumf %62, %63 : vector<8x288xf32>
    %c0_17 = arith.constant 0 : index
    %c0_18 = arith.constant 0 : index
    %c0_19 = arith.constant 0 : index
    %65 = vector.load %arg4[%c0_17, %c0_18, %c0_19] : memref<2x8x288xf32, #tpu.memory_space<vmem>>, vector<1x8x288xf32>
    %66 = vector.shape_cast %65 : vector<1x8x288xf32> to vector<8x288xf32>
    %67 = vector.shape_cast %64 : vector<8x288xf32> to vector<1x8x288xf32>
    tpu.vector_store %arg4[%c0_17, %c0_18, %c0_19], %67 {strides = array<i32>} : memref<2x8x288xf32, #tpu.memory_space<vmem>>, vector<1x8x288xf32>,
    %68 = vector.broadcast %38 : vector<8x1xf32> to vector<8x288xf32>
    %69 = arith.subf %31, %68 : vector<8x288xf32>
    %70 = vector.broadcast %58 : vector<8x1xf32> to vector<8x288xf32>
    %71 = arith.mulf %69, %70 : vector<8x288xf32>
    %cst_20 = arith.constant 0.000000e+00 : f32
    %72 = vector.broadcast %cst_20 : f32 to vector<8x288xf32>
    %73 = arith.maximumf %71, %72 : vector<8x288xf32>
    %c1_21 = arith.constant 1 : index
    %c0_22 = arith.constant 0 : index
    %c0_23 = arith.constant 0 : index
    %74 = vector.load %arg4[%c1_21, %c0_22, %c0_23] : memref<2x8x288xf32, #tpu.memory_space<vmem>>, vector<1x8x288xf32>
    %75 = vector.shape_cast %74 : vector<1x8x288xf32> to vector<8x288xf32>
    %76 = vector.shape_cast %73 : vector<8x288xf32> to vector<1x8x288xf32>
    tpu.vector_store %arg4[%c1_21, %c0_22, %c0_23], %76 {strides = array<i32>} : memref<2x8x288xf32, #tpu.memory_space<vmem>>, vector<1x8x288xf32>,
    return
  }
  func.func @transform_0(%arg0: i32) -> (i32, i32, i32) {
    %c0_i32 = arith.constant 0 : i32
    %c0_i32_0 = arith.constant 0 : i32
    %c0_i32_1 = arith.constant 0 : i32
    %c0_i32_2 = arith.constant 0 : i32
    return %c0_i32, %c0_i32_0, %c0_i32_1 : i32, i32, i32
  }
  func.func @transform_1(%arg0: i32) -> (i32, i32) {
    %c0_i32 = arith.constant 0 : i32
    %c0_i32_0 = arith.constant 0 : i32
    %c0_i32_1 = arith.constant 0 : i32
    return %c0_i32, %c0_i32_0 : i32, i32
  }
  func.func @transform_2(%arg0: i32) -> (i32, i32) {
    %c0_i32 = arith.constant 0 : i32
    %c0_i32_0 = arith.constant 0 : i32
    %c0_i32_1 = arith.constant 0 : i32
    return %c0_i32, %c0_i32_0 : i32, i32
  }
  func.func @transform_3(%arg0: i32) -> (i32, i32, i32) {
    %c0_i32 = arith.constant 0 : i32
    %c0_i32_0 = arith.constant 0 : i32
    %c0_i32_1 = arith.constant 0 : i32
    %c0_i32_2 = arith.constant 0 : i32
    return %c0_i32, %c0_i32_0, %c0_i32_1 : i32, i32, i32
  }
}

</mosaic_0001>

<bundles_post_ra>
// kernel: basic_layer_forward.1
= control target key start
LH: loop header
LB: loop body
LE: loop exit
PB: predicated region body
PF: predicated region fallthrough
CT: control target
= control target key end

     0   :  { %v695_v2 = vmov 0.0   ;;  %s696_s16 = smov 92   ;;  %s697_s17 = smov 90   ;;  %vm703_vm0 = vmmov 0   ;;  %vm117_vm1 = vcmask 1043456   ;;  %vm114_vm2 = vcmask 736256   ;;  %s965_s0 = inlined_call_operand.vmem [shape: f32[2,4,342], index: 0, kind: input, shape index: {}]   ;;  %s966_s1 = inlined_call_operand.vmem [shape: f32[8,36], index: 1, kind: input, shape index: {}]   ;;  %s967_s2 = inlined_call_operand.vmem [shape: f32[1,288], index: 2, kind: input, shape index: {}]   ;;  %s968_s3 = inlined_call_operand.vmem [shape: f32[2,8,288], index: 3, kind: output, shape index: {}]  }
   0x1   :  { %v728_v0 = vld [vmem:[%s965_s0 + $0x8] sm:$0xf]  ;;  %v733_v1 = vld [vmem:[%s965_s0] sm:$0xff]  ;;  %651 = vmatprep.subr.mxu1 %v695_v2  ;;  %204 = vmatprep.mubr.f32.mxu0 %v695_v2  ;;  %s698_s18 = smov 91   ;;  %s699_s19 = smov 109   ;;  %v788_v6 = vld [vmem:[%s965_s0 + $0xc] sm:$0xff] }
   0x2   :  { %88 = vrot.lane.b32.xlu1 %v728_v0, %s696_s16  ;;  %112 = vrot.lane.b32.xlu0 %v728_v0, %s697_s17  ;;  %v743_v3 = vcombine.high %v733_v1, %v733_v1  ;;  %v23_v4 = vcombine.low %v728_v0, %v728_v0  ;;  %v22_v5 = vcombine.low %v733_v1, %v733_v1  ;;  %s700_s20 = smov 108   ;;  %s701_s21 = smov 126   ;;  %v799_v8 = vld [vmem:[%s965_s0 + $0x14] sm:$0xf]  ;;  %vm102_vm3 = vcmask 744448   ;;  %v882_v61 = vld [vmem:[%s966_s1] sm:$0xff] }
   0x3   :  { %s702_s22 = smov 110   ;;  %661 = vmatprep.mubr.msk.f32.mxu1 %vm703_vm0, %v695_v2  ;;  %s704_s23 = smov 127   ;;  %v794_v7 = vcombine.high %v788_v6, %v788_v6  ;;  %v314_v9 = vcombine.low %v799_v8, %v799_v8  ;;  %v313_v10 = vcombine.low %v788_v6, %v788_v6  ;;  %vm90_vm4 = vcmask 752640  }
   0x4   :  { %vm66_vm5 = vcmask 891904   ;;  %vm78_vm6 = vcmask 883712   ;;  %vm42_vm7 = vcmask 1031168   ;;  %vm54_vm8 = vcmask 900096  }
   0x5   :  { %vm30_vm9 = vcmask 1039360   ;;  %vm130_vm10 = vcmask 293888   ;;  %vm301_vm11 = vcmask 261120  }
   0x6   :  { %86 = vrot.lane.b32.xlu1 %v743_v3, %s696_s16  ;;  %110 = vrot.lane.b32.xlu0 %v743_v3, %s697_s17 }
   0xa   :  { %100 = vrot.lane.b32.xlu1 %v23_v4, %s698_s18  ;;  %98 = vrot.lane.b32.xlu0 %v733_v1, %s698_s18 }
   0xe   :  { %84 = vrot.lane.b32.xlu1 %v733_v1, %s696_s16  ;;  %108 = vrot.lane.b32.xlu0 %v733_v1, %s697_s17 }
  0x12   :  { %62 = vrot.lane.b32.xlu1 %v743_v3, %s699_s19  ;;  %96 = vrot.lane.b32.xlu0 %v22_v5, %s698_s18 }
  0x16   :  { %74 = vrot.lane.b32.xlu1 %v733_v1, %s700_s20  ;;  %64 = vrot.lane.b32.xlu0 %v728_v0, %s699_s19 }
  0x1a   :  { %60 = vrot.lane.b32.xlu1 %v733_v1, %s699_s19  ;;  %76 = vrot.lane.b32.xlu0 %v23_v4, %s700_s20 }
  0x1e   :  { %38 = vrot.lane.b32.xlu1 %v743_v3, %s701_s21  ;;  %72 = vrot.lane.b32.xlu0 %v22_v5, %s700_s20 }
  0x22   :  { %50 = vrot.lane.b32.xlu1 %v733_v1, %s702_s22  ;;  %40 = vrot.lane.b32.xlu0 %v728_v0, %s701_s21 }
  0x26   :  { %36 = vrot.lane.b32.xlu1 %v733_v1, %s701_s21  ;;  %52 = vrot.lane.b32.xlu0 %v23_v4, %s702_s22 }
  0x2a   :  { %26 = vrot.lane.b32.xlu1 %v733_v1, %s704_s23  ;;  %48 = vrot.lane.b32.xlu0 %v22_v5, %s702_s22 }
  0x2e   :  { %24 = vrot.lane.b32.xlu1 %v22_v5, %s704_s23  ;;  %28 = vrot.lane.b32.xlu0 %v23_v4, %s704_s23 }
  0x32   :  { %396 = vrot.lane.b32.xlu1 %v799_v8, %s697_s17  ;;  %394 = vrot.lane.b32.xlu0 %v794_v7, %s697_s17 }
  0x36   :  { %374 = vrot.lane.b32.xlu1 %v799_v8, %s696_s16  ;;  %372 = vrot.lane.b32.xlu0 %v794_v7, %s696_s16 }
  0x3a   :  { %385 = vrot.lane.b32.xlu1 %v314_v9, %s698_s18  ;;  %383 = vrot.lane.b32.xlu0 %v788_v6, %s698_s18 }
  0x3e   :  { %370 = vrot.lane.b32.xlu1 %v788_v6, %s696_s16  ;;  %392 = vrot.lane.b32.xlu0 %v788_v6, %s697_s17 }
  0x42   :  { %350 = vrot.lane.b32.xlu1 %v794_v7, %s699_s19  ;;  %381 = vrot.lane.b32.xlu0 %v313_v10, %s698_s18 }
  0x46   :  { %361 = vrot.lane.b32.xlu1 %v788_v6, %s700_s20  ;;  %352 = vrot.lane.b32.xlu0 %v799_v8, %s699_s19 }
  0x4a   :  { %348 = vrot.lane.b32.xlu1 %v788_v6, %s699_s19  ;;  %363 = vrot.lane.b32.xlu0 %v314_v9, %s700_s20 }
  0x4e   :  { %328 = vrot.lane.b32.xlu1 %v794_v7, %s701_s21  ;;  %359 = vrot.lane.b32.xlu0 %v313_v10, %s700_s20 }
  0x52   :  { %339 = vrot.lane.b32.xlu1 %v788_v6, %s702_s22  ;;  %330 = vrot.lane.b32.xlu0 %v799_v8, %s701_s21 }
  0x56   :  { %326 = vrot.lane.b32.xlu1 %v788_v6, %s701_s21  ;;  %341 = vrot.lane.b32.xlu0 %v314_v9, %s702_s22 }
  0x5a   :  { %317 = vrot.lane.b32.xlu1 %v788_v6, %s704_s23  ;;  %337 = vrot.lane.b32.xlu0 %v313_v10, %s702_s22 }
  0x5e   :  { %315 = vrot.lane.b32.xlu1 %v313_v10, %s704_s23  ;;  %319 = vrot.lane.b32.xlu0 %v314_v9, %s704_s23 }
  0x74   :  { %v89_v11 = vpop.permute.xlu1 %88  ;;  %v113_v12 = vpop.permute.xlu0 %112 }
  0x75   :  { %652 = vmatpush3.msk.msra.mxu1 %vm117_vm1, %v113_v12 }
  0x76   :  { %653 = vmatprep.subr.mxu1 %v695_v2 }
  0x78   :  { %v87_v13 = vpop.permute.xlu1 %86  ;;  %v111_v14 = vpop.permute.xlu0 %110 }
  0x79   :  { %v116_v15 = vsel %vm114_vm2, %v111_v14, %v113_v12  ;;  %v92_v22 = vsel %vm90_vm4, %v87_v13, %v89_v11 }
  0x7a   :  { %624 = vmatprep.subr.msk.mxu0 %vm117_vm1, %v116_v15 }
  0x7c   :  { %v101_v16 = vpop.permute.xlu1 %100  ;;  %v99_v17 = vpop.permute.xlu0 %98 }
  0x7d   :  { %v129_v18 = vsel %vm117_vm1, %v89_v11, %v101_v16  ;;  %v104_v19 = vsel %vm102_vm3, %v99_v17, %v101_v16 }
  0x7e   :  { %654 = vmatpush3.msra.mxu1 %v129_v18  ;;  %v128_v24 = vsel %vm117_vm1, %v92_v22, %v104_v19 }
  0x7f   :  { %655 = vmatprep.subr.mxu1 %v695_v2 }
  0x80   :  { %v85_v20 = vpop.permute.xlu1 %84  ;;  %v109_v21 = vpop.permute.xlu0 %108 }
  0x81   :  { %v115_v23 = vsel %vm114_vm2, %v109_v21, %v111_v14  ;;  %v91_v27 = vsel %vm90_vm4, %v85_v20, %v87_v13 }
  0x82   :  { %625 = vmatpush1.msk.msra.mxu0 %vm117_vm1, %v115_v23 }
  0x83   :  { %164 = vmatprep.subr.mxu0 %v128_v24 }
  0x84   :  { %v63_v25 = vpop.permute.xlu1 %62  ;;  %v97_v26 = vpop.permute.xlu0 %96 }
  0x85   :  { %v103_v28 = vsel %vm102_vm3, %v97_v26, %v99_v17 }
  0x86   :  { %v127_v29 = vsel %vm117_vm1, %v91_v27, %v103_v28 }
  0x87   :  { %165 = vmatpush1.msra.mxu0 %v127_v29 }
  0x88   :  { %v75_v30 = vpop.permute.xlu1 %74  ;;  %v65_v31 = vpop.permute.xlu0 %64 }
  0x89   :  { %v68_v34 = vsel %vm66_vm5, %v63_v25, %v65_v31 }
  0x8c   :  { %v61_v32 = vpop.permute.xlu1 %60  ;;  %v77_v33 = vpop.permute.xlu0 %76 }
  0x8d   :  { %v80_v35 = vsel %vm78_vm6, %v75_v30, %v77_v33  ;;  %v126_v36 = vsel %vm117_vm1, %v65_v31, %v77_v33  ;;  %v67_v40 = vsel %vm66_vm5, %v61_v32, %v63_v25 }
  0x8e   :  { %656 = vmatpush3.msra.mxu1 %v126_v36  ;;  %v125_v37 = vsel %vm117_vm1, %v68_v34, %v80_v35 }
  0x8f   :  { %166 = vmatprep.subr.mxu0 %v125_v37  ;;  %657 = vmatprep.subr.mxu1 %v695_v2 }
  0x90   :  { %v39_v38 = vpop.permute.xlu1 %38  ;;  %v73_v39 = vpop.permute.xlu0 %72 }
  0x91   :  { %v79_v41 = vsel %vm78_vm6, %v73_v39, %v75_v30 }
  0x92   :  { %v124_v42 = vsel %vm117_vm1, %v67_v40, %v79_v41 }
  0x93   :  { %167 = vmatpush1.msra.mxu0 %v124_v42 }
  0x94   :  { %v51_v43 = vpop.permute.xlu1 %50  ;;  %v41_v44 = vpop.permute.xlu0 %40 }
  0x95   :  { %v44_v47 = vsel %vm42_vm7, %v39_v38, %v41_v44 }
  0x98   :  { %v37_v45 = vpop.permute.xlu1 %36  ;;  %v53_v46 = vpop.permute.xlu0 %52 }
  0x99   :  { %v56_v48 = vsel %vm54_vm8, %v51_v43, %v53_v46  ;;  %v123_v49 = vsel %vm117_vm1, %v41_v44, %v53_v46  ;;  %v43_v53 = vsel %vm42_vm7, %v37_v45, %v39_v38 }
  0x9a   :  { %658 = vmatpush3.msra.mxu1 %v123_v49  ;;  %v122_v50 = vsel %vm117_vm1, %v44_v47, %v56_v48 }
  0x9b   :  { %168 = vmatprep.subr.mxu0 %v122_v50  ;;  %659 = vmatprep.subr.mxu1 %v695_v2 }
  0x9c   :  { %v27_v51 = vpop.permute.xlu1 %26  ;;  %v49_v52 = vpop.permute.xlu0 %48 }
  0x9d   :  { %v55_v54 = vsel %vm54_vm8, %v49_v52, %v51_v43 }
  0x9e   :  { %v121_v55 = vsel %vm117_vm1, %v43_v53, %v55_v54 }
  0x9f   :  { %169 = vmatpush1.msra.mxu0 %v121_v55  ;;  %v282_v55 = vlaneseq }
  0xa0   :  { %v25_v56 = vpop.permute.xlu1 %24  ;;  %v29_v57 = vpop.permute.xlu0 %28 }
  0xa1   :  { %v31_v58 = vsel %vm30_vm9, %v25_v56, %v27_v51  ;;  %v32_v59 = vsel %vm30_vm9, %v27_v51, %v29_v57  ;;  %v120_v60 = vsel %vm117_vm1, %v728_v0, %v29_v57  ;;  %v283_v56 = vshrl.u32 %v282_v55, 7 }
  0xa2   :  { %660 = vmatpush3.msra.mxu1 %v120_v60  ;;  %v119_v62 = vsel %vm117_vm1, %v743_v3, %v32_v59  ;;  %v118_v63 = vsel %vm117_vm1, %v733_v1, %v31_v58 }
  0xa3   :  { %170 = vmatprep.subr.mxu0 %v119_v62  ;;  %664 = vmatprep.subr.mxu1 %v695_v2  ;;  %v292_v57 = vsub.s32 2, %v283_v56  ;;  %v284_v58 = vsub.s32 0, %v283_v56 }
  0xa4   :  { %v397_v4 = vpop.permute.xlu1 %396  ;;  %171 = vmatpush1.msra.mxu0 %v118_v63  ;;  %v395_v5 = vpop.permute.xlu0 %394  ;;  %662 = vmatmul.mubr.msk.f32.vlgmr.msra.gmra.mxu1 %vm130_vm10, %v882_v61 }
  0xa5   :  { %v399_v0 = vsel %vm114_vm2, %v395_v5, %v397_v4  ;;  %665 = vmatpush3.msk.msra.mxu1 %vm117_vm1, %v397_v4  ;;  %626 = vmatmul.mubr.msk.f32.vlgmr.msra.gmra.mxu0 %vm130_vm10, %v882_v61 }
  0xa6   :  { %631 = vmatprep.subr.msk.mxu0 %vm117_vm1, %v399_v0  ;;  %666 = vmatprep.subr.mxu1 %v695_v2 }
  0xa7   :  { %482 = vmatprep.mubr.f32.mxu0 %v695_v2  ;;  %674 = vmatprep.mubr.msk.f32.mxu1 %vm703_vm0, %v695_v2 }
  0xa8   :  { %v375_v1 = vpop.permute.xlu1 %374  ;;  %v373_v3 = vpop.permute.xlu0 %372 }
  0xa9   :  { %v377_v15 = vsel %vm90_vm4, %v373_v3, %v375_v1 }
  0xac   :  { %v386_v9 = vpop.permute.xlu1 %385  ;;  %v384_v10 = vpop.permute.xlu0 %383 }
  0xad   :  { %v411_v11 = vsel %vm117_vm1, %v375_v1, %v386_v9  ;;  %v388_v12 = vsel %vm102_vm3, %v384_v10, %v386_v9 }
  0xae   :  { %667 = vmatpush3.msra.mxu1 %v411_v11  ;;  %v410_v17 = vsel %vm117_vm1, %v377_v15, %v388_v12 }
  0xaf   :  { %668 = vmatprep.subr.mxu1 %v695_v2 }
  0xb0   :  { %v371_v13 = vpop.permute.xlu1 %370  ;;  %v393_v14 = vpop.permute.xlu0 %392 }
  0xb1   :  { %v398_v16 = vsel %vm114_vm2, %v393_v14, %v395_v5  ;;  %v376_v20 = vsel %vm90_vm4, %v371_v13, %v373_v3 }
  0xb2   :  { %632 = vmatpush1.msk.msra.mxu0 %vm117_vm1, %v398_v16 }
  0xb3   :  { %442 = vmatprep.subr.mxu0 %v410_v17 }
  0xb4   :  { %v351_v18 = vpop.permute.xlu1 %350  ;;  %v382_v19 = vpop.permute.xlu0 %381 }
  0xb5   :  { %v387_v21 = vsel %vm102_vm3, %v382_v19, %v384_v10 }
  0xb6   :  { %v409_v22 = vsel %vm117_vm1, %v376_v20, %v387_v21 }
  0xb7   :  { %443 = vmatpush1.msra.mxu0 %v409_v22 }
  0xb8   :  { %v362_v23 = vpop.permute.xlu1 %361  ;;  %v353_v24 = vpop.permute.xlu0 %352 }
  0xb9   :  { %v355_v27 = vsel %vm66_vm5, %v351_v18, %v353_v24 }
  0xbc   :  { %v349_v25 = vpop.permute.xlu1 %348  ;;  %v364_v26 = vpop.permute.xlu0 %363 }
  0xbd   :  { %v366_v28 = vsel %vm78_vm6, %v362_v23, %v364_v26  ;;  %v408_v29 = vsel %vm117_vm1, %v353_v24, %v364_v26  ;;  %v354_v33 = vsel %vm66_vm5, %v349_v25, %v351_v18 }
  0xbe   :  { %669 = vmatpush3.msra.mxu1 %v408_v29  ;;  %v407_v30 = vsel %vm117_vm1, %v355_v27, %v366_v28 }
  0xbf   :  { %444 = vmatprep.subr.mxu0 %v407_v30  ;;  %670 = vmatprep.subr.mxu1 %v695_v2 }
  0xc0   :  { %v329_v31 = vpop.permute.xlu1 %328  ;;  %v360_v32 = vpop.permute.xlu0 %359 }
  0xc1   :  { %v365_v34 = vsel %vm78_vm6, %v360_v32, %v362_v23 }
  0xc2   :  { %v406_v35 = vsel %vm117_vm1, %v354_v33, %v365_v34 }
  0xc3   :  { %445 = vmatpush1.msra.mxu0 %v406_v35 }
  0xc4   :  { %v340_v36 = vpop.permute.xlu1 %339  ;;  %v331_v37 = vpop.permute.xlu0 %330 }
  0xc5   :  { %v333_v40 = vsel %vm42_vm7, %v329_v31, %v331_v37 }
  0xc8   :  { %v327_v38 = vpop.permute.xlu1 %326  ;;  %v342_v39 = vpop.permute.xlu0 %341 }
  0xc9   :  { %v344_v41 = vsel %vm54_vm8, %v340_v36, %v342_v39  ;;  %v405_v42 = vsel %vm117_vm1, %v331_v37, %v342_v39  ;;  %v332_v46 = vsel %vm42_vm7, %v327_v38, %v329_v31 }
  0xca   :  { %671 = vmatpush3.msra.mxu1 %v405_v42  ;;  %v404_v43 = vsel %vm117_vm1, %v333_v40, %v344_v41 }
  0xcb   :  { %446 = vmatprep.subr.mxu0 %v404_v43  ;;  %672 = vmatprep.subr.mxu1 %v695_v2 }
  0xcc   :  { %v318_v44 = vpop.permute.xlu1 %317  ;;  %v338_v45 = vpop.permute.xlu0 %337 }
  0xcd   :  { %v343_v47 = vsel %vm54_vm8, %v338_v45, %v340_v36 }
  0xce   :  { %v403_v48 = vsel %vm117_vm1, %v332_v46, %v343_v47 }
  0xcf   :  { %447 = vmatpush1.msra.mxu0 %v403_v48 }
  0xd0   :  { %v316_v49 = vpop.permute.xlu1 %315  ;;  %v320_v50 = vpop.permute.xlu0 %319 }
  0xd1   :  { %v321_v51 = vsel %vm30_vm9, %v316_v49, %v318_v44  ;;  %v322_v52 = vsel %vm30_vm9, %v318_v44, %v320_v50  ;;  %v402_v53 = vsel %vm117_vm1, %v799_v8, %v320_v50  ;;  %v15_v8 = vld [vmem:[%s967_s2] sm:$0x7] }
  0xd2   :  { %673 = vmatpush3.msra.mxu1 %v402_v53  ;;  %v401_v2 = vsel %vm117_vm1, %v794_v7, %v322_v52  ;;  %v400_v54 = vsel %vm117_vm1, %v788_v6, %v321_v51  ;;  %v288_v7 = vsub.s32 1, %v283_v56  ;;  %v293_v59 = vrot.slane %v15_v8, %v292_v57 }
  0xd3   :  { %448 = vmatprep.subr.mxu0 %v401_v2  ;;  %675 = vmatmul.mubr.msk.f32.vlgmr.msra.gmra.mxu1 %vm130_vm10, %v882_v61  ;;  %v285_v60 = vrot.slane %v15_v8, %v284_v58 }
  0xd4   :  { %449 = vmatpush1.msra.mxu0 %v400_v54  ;;  %v289_v6 = vrot.slane %v15_v8, %v288_v7 }
  0xd5   :  { %633 = vmatmul.mubr.msk.f32.vlgmr.msra.gmra.mxu0 %vm130_vm10, %v882_v61 }
 0x164   :  { %v277_v62 = vpop.f32.mrf.mxu1 }
 0x165   :  { %v206_v63 = vpop.f32.mrf.mxu0  ;;  %v299_v4 = vmul.f32 %v293_v59, %v277_v62 }
 0x166   :  { %v297_v5 = vmul.f32 %v285_v60, %v206_v63  ;;  %v663_v0 = vpop.f32.mrf.mxu1 }
 0x167   :  { %v208_v1 = vpop.f32.mrf.mxu0  ;;  %v302_v3 = vsel %vm301_vm11, %v299_v4, 0.0 }
 0x168   :  { %v298_v61 = vmul.f32 %v289_v6, %v208_v1 }
 0x16a   :  { %v300_v9 = vadd.f32 %v298_v61, %v297_v5 }
 0x16c   :  { %v303_v10 = vadd.f32 %v302_v3, %v300_v9 }
 0x16e   :  { %304 = vadd.xlane.f32.xlu0 %v303_v10 }
 0x193   :  { %v555_v11 = vpop.f32.mrf.mxu1 }
 0x194   :  { %v561_v13 = vmul.f32 %v555_v11, %v293_v59 }
 0x195   :  { %v484_v12 = vpop.f32.mrf.mxu0  ;;  %v676_v14 = vpop.f32.mrf.mxu1 }
 0x196   :  { %v559_v16 = vmul.f32 %v484_v12, %v285_v60  ;;  %v563_v18 = vsel %vm301_vm11, %v561_v13, 0.0 }
 0x197   :  { %v486_v15 = vpop.f32.mrf.mxu0 }
 0x198   :  { %v560_v17 = vmul.f32 %v486_v15, %v289_v6 }
 0x19a   :  { %v562_v19 = vadd.f32 %v560_v17, %v559_v16 }
 0x19c   :  { %v564_v20 = vadd.f32 %v563_v18, %v562_v19 }
 0x19e   :  { %565 = vadd.xlane.f32.xlu1 %v564_v20 }
 0x1f7   :  { %v305_v21 = vpop.xlane.xlu0 %304 }
 0x227   :  { %v566_v22 = vpop.xlane.xlu1 %565 }
 0x228   :  { %v567_v23 = vadd.f32 %v566_v22, %v305_v21 }
 0x22a   :  { %v568_v24 = vmul.f32 0.001953125, %v567_v23 }
 0x22c   :  { %v569_v25 = vsub.f32 %v206_v63, %v568_v24  ;;  %v570_v26 = vsub.f32 %v208_v1, %v568_v24  ;;  %v571_v27 = vsub.f32 %v277_v62, %v568_v24  ;;  %v583_v28 = vsub.f32 %v484_v12, %v568_v24 }
 0x22d   :  { %v584_v29 = vsub.f32 %v486_v15, %v568_v24  ;;  %v585_v30 = vsub.f32 %v555_v11, %v568_v24 }
 0x22e   :  { %v572_v31 = vmul.f32 %v569_v25, %v285_v60  ;;  %v573_v32 = vmul.f32 %v570_v26, %v289_v6  ;;  %v574_v33 = vmul.f32 %v571_v27, %v293_v59  ;;  %v586_v34 = vmul.f32 %v583_v28, %v285_v60 }
 0x22f   :  { %v587_v35 = vmul.f32 %v584_v29, %v289_v6  ;;  %v588_v36 = vmul.f32 %v585_v30, %v293_v59 }
 0x230   :  { %v575_v37 = vmul.f32 %v572_v31, %v572_v31  ;;  %v576_v38 = vmul.f32 %v573_v32, %v573_v32  ;;  %v577_v39 = vmul.f32 %v574_v33, %v574_v33  ;;  %v589_v40 = vmul.f32 %v586_v34, %v586_v34 }
 0x231   :  { %v590_v41 = vmul.f32 %v587_v35, %v587_v35  ;;  %v591_v42 = vmul.f32 %v588_v36, %v588_v36 }
 0x232   :  { %v578_v43 = vadd.f32 %v576_v38, %v575_v37  ;;  %v579_v44 = vsel %vm301_vm11, %v577_v39, 0.0 }
 0x233   :  { %v592_v46 = vadd.f32 %v590_v41, %v589_v40  ;;  %v593_v47 = vsel %vm301_vm11, %v591_v42, 0.0 }
 0x234   :  { %v580_v45 = vadd.f32 %v579_v44, %v578_v43 }
 0x235   :  { %v594_v48 = vadd.f32 %v593_v47, %v592_v46 }
 0x236   :  { %581 = vadd.xlane.f32.xlu0 %v580_v45 }
 0x23a   :  { %595 = vadd.xlane.f32.xlu0 %v594_v48 }
 0x2bf   :  { %v582_v49 = vpop.xlane.xlu0 %581 }
 0x2c3   :  { %v596_v50 = vpop.xlane.xlu0 %595 }
 0x2c4   :  { %v597_v51 = vadd.f32 %v596_v50, %v582_v49 }
 0x2c6   :  { %v598_v52 = vmul.f32 0.001953125, %v597_v51 }
 0x2c8   :  { %v599_v53 = vadd.f32 1e-05, %v598_v52 }
 0x2ca   :  { %693 = vrsqrt.f32 %v599_v53 }
 0x2d7   :  { %v694_v2 = vpop.eup %693 }
 0x2d8   :  { %v601_v54 = vmul.f32 %v694_v2, %v569_v25  ;;  %v602_v55 = vmul.f32 %v694_v2, %v570_v26  ;;  %v603_v56 = vmul.f32 %v694_v2, %v571_v27  ;;  %v610_v57 = vmul.f32 %v694_v2, %v583_v28 }
 0x2d9   :  { %v611_v8 = vmul.f32 %v694_v2, %v584_v29  ;;  %v612_v58 = vmul.f32 %v694_v2, %v585_v30 }
 0x2da   :  { %v604_v7 = vmax.f32 %v601_v54, 0.0  ;;  %v605_v59 = vmax.f32 %v602_v55, 0.0  ;;  %v606_v60 = vmax.f32 %v603_v56, 0.0  ;;  %v613_v6 = vmax.f32 %v610_v57, 0.0 }
 0x2db   :  { %v614_v62 = vmax.f32 %v611_v8, 0.0  ;;  %v615_v63 = vmax.f32 %v612_v58, 0.0 }
 0x2dc   :  { %607 = vst [vmem:[%s968_s3] sm:$0xff] %v604_v7  ;;  %608 = vst [vmem:[%s968_s3 + $0x8] sm:$0xff] %v605_v59 }
 0x2dd   :  { %609 = vst.msk [vmem:[%s968_s3 + $0x10] sm:$0xff] %vm301_vm11, %v606_v60  ;;  %636 = vst [vmem:[%s968_s3 + $0x18] sm:$0xff] %v613_v6 }
 0x2de   :  { %637 = vst [vmem:[%s968_s3 + $0x20] sm:$0xff] %v614_v62  ;;  %638 = vst.msk [vmem:[%s968_s3 + $0x28] sm:$0xff] %vm301_vm11, %v615_v63 }

</bundles_post_ra>
